<compile_context>
chip_gen: v5e
topology: v5e:2x2
jax: 0.10.0
libtpu: 0.0.40
codegen_flags: <defaults>
</compile_context>

<pallas_src>
import jax
import jax.numpy as jnp
from jax import lax
from jax.experimental import pallas as pl
from jax.experimental.pallas import tpu as pltpu


def _scores_ctx_kernel(dec_ref, enc_feat_ref, enc_out_ref, mask_ref, cov_ref,
                       wf_t_ref, bf_ref, wc_ref, v_ref,
                       e_ref, ctx_ref,
                       dec_feat_sc, m_sc, l_sc, acc_sc):
    """Per (B-tile, S-tile): raw scores e + flash-style masked context accum."""
    s = pl.program_id(1)

    @pl.when(s == 0)
    def _init():
        # decoder_features = Linear(2H, 2H)(decoder_hidden)   -> (tb, 2H)
        # computed once per batch tile, kept resident in VMEM scratch.
        dec_feat_sc[...] = (
            jnp.dot(dec_ref[...].astype(jnp.float32), wf_t_ref[...],
                    preferred_element_type=jnp.float32) + bf_ref[...])
        m_sc[...] = jnp.full(m_sc.shape, -jnp.inf, m_sc.dtype)
        l_sc[...] = jnp.zeros(l_sc.shape, l_sc.dtype)
        acc_sc[...] = jnp.zeros(acc_sc.shape, acc_sc.dtype)

    # ---- attention scores for this S tile ---------------------------------
    enc_feat = enc_feat_ref[...].astype(jnp.float32)                # (tb, ts, 2H)
    att = (enc_feat
           + dec_feat_sc[...][:, None, :]                           # decoder feats
           + cov_ref[...][:, :, None] * wc_ref[...][None, :, :])    # coverage feats
    e = jnp.sum(jnp.tanh(att) * v_ref[...][None, :, :], axis=-1)    # (tb, ts)
    e_ref[...] = e                                                  # lane-dense store

    # ---- online (flash-style) masked-softmax statistics + context ---------
    mask = mask_ref[...]                                            # (tb, ts)
    m_prev = m_sc[...]
    m_new = jnp.maximum(m_prev, jnp.max(e, axis=-1, keepdims=True))
    alpha = jnp.exp(m_prev - m_new)
    p = mask * jnp.exp(e - m_new)                                   # masked, unnormalized
    l_sc[...] = alpha * l_sc[...] + jnp.sum(p, axis=-1, keepdims=True)
    # context partial sum on the MXU: (tb,1,ts) @ (tb,ts,2H) -> (tb,1,2H)
    pv = lax.dot_general(
        p.astype(enc_out_ref.dtype)[:, None, :], enc_out_ref[...],
        dimension_numbers=(((2,), (1,)), ((0,), (0,))),
        preferred_element_type=jnp.float32)[:, 0, :]                # (tb, 2H)
    acc_sc[...] = alpha * acc_sc[...] + pv
    m_sc[...] = m_new

    @pl.when(s == pl.num_programs(1) - 1)
    def _finalize():
        # context = sum_s attn * encoder_out ; attn = p / sum(p)
        # (if a row is fully masked this is 0/0 = NaN, same as the PyTorch original)
        ctx_ref[...] = (acc_sc[...] * pl.reciprocal(l_sc[...])).astype(ctx_ref.dtype)


def _finalize_attention_kernel(e_ref, mask_ref, cov_ref, attn_ref, cov_out_ref):
    """attention = mask*exp(e - max) / sum(mask*exp(e - max)); coverage += attention.

    Single masked normalization == softmax(dim=0) -> *mask -> Normalize(0) of
    the original module (the intermediate softmax denominator cancels).
    """
    e = e_ref[...]                                                   # (tb, S)
    mask = mask_ref[...]
    m = jnp.max(e, axis=-1, keepdims=True)
    p = mask * jnp.exp(e - m)
    attn = p * pl.reciprocal(jnp.sum(p, axis=-1, keepdims=True))
    attn_ref[...] = attn.astype(attn_ref.dtype)
    cov_out_ref[...] = (cov_ref[...] + attn).astype(cov_out_ref.dtype)


def attention_forward(params, decoder_hidden, encoder_out, encoder_features,
                      encoder_mask, coverage=None, *,
                      s_tile=512, stage_dtype=jnp.bfloat16):
    """Pallas forward of the pointer-generator Attention module.

    stage_dtype: storage dtype for the two big read-only encoder tensors
    (bfloat16 halves HBM traffic; pass jnp.float32 for exact f32 parity).
    """
    S, B, H2 = encoder_features.shape
    f32 = jnp.float32

    # ---- layout glue: batch-major, lane-dense (S on the 128-lane axis) ----
    # The encoder_features transpose replaces the previous encoder_out
    # transpose; ideally the caller precomputes it batch-major once per source.
    enc_feat = jnp.transpose(encoder_features, (1, 0, 2)).astype(stage_dtype)  # (B,S,2H)
    enc_out = encoder_out.astype(stage_dtype)                                  # (B,S,2H)
    mask = jnp.transpose(encoder_mask, (1, 0)).astype(f32)                     # (B,S)
    cov = jnp.zeros((B, S), f32) if coverage is None else coverage.astype(f32)
    dec = decoder_hidden.astype(f32)

    # ---- S tiling; pad S so every tile is full (mask == 0 in the padding) --
    if S <= s_tile:
        tile_s, s_pad = S, S
    else:
        tile_s = s_tile                                  # multiple of 8 and 128
        s_pad = pl.cdiv(S, tile_s) * tile_s
    if s_pad != S:
        pad = s_pad - S
        enc_feat = jnp.pad(enc_feat, ((0, 0), (0, pad), (0, 0)))
        enc_out = jnp.pad(enc_out, ((0, 0), (0, pad), (0, 0)))
        mask = jnp.pad(mask, ((0, 0), (0, pad)))
        cov = jnp.pad(cov, ((0, 0), (0, pad)))

    tile_b = 8 if (B > 8 and B % 8 == 0) else B          # keeps (8,128) rule satisfied
    nb, ns = B // tile_b, s_pad // tile_s

    # VMEM budget: 2 big inputs x 2 pipeline buffers per S tile + small stuff.
    # (Keep tile_s/tile_b small enough that this stays well under 64 MiB on v7x.)
    stage_bytes = jnp.dtype(stage_dtype).itemsize
    need = (2 * 2 * tile_b * tile_s * H2 * stage_bytes
            + 8 * tile_b * max(tile_s, H2) * 4 + H2 * H2 * 4 + (1 << 20))
    vmem_limit = int(min(100 << 20, max(32 << 20, 2 * need)))

    # ---- kernel 1: streamed scores + online masked softmax + context ------
    e_scores, context = pl.pallas_call(
        _scores_ctx_kernel,
        out_shape=(jax.ShapeDtypeStruct((B, s_pad), f32),   # raw scores e
                   jax.ShapeDtypeStruct((B, H2), f32)),     # context
        grid_spec=pltpu.PrefetchScalarGridSpec(
            num_scalar_prefetch=0,
            grid=(nb, ns),
            in_specs=[
                pl.BlockSpec((tile_b, H2), lambda b, s: (b, 0)),             # decoder_hidden
                pl.BlockSpec((tile_b, tile_s, H2), lambda b, s: (b, s, 0)),  # encoder_features
                pl.BlockSpec((tile_b, tile_s, H2), lambda b, s: (b, s, 0)),  # encoder_out
                pl.BlockSpec((tile_b, tile_s), lambda b, s: (b, s)),         # mask
                pl.BlockSpec((tile_b, tile_s), lambda b, s: (b, s)),         # coverage
                pl.BlockSpec((H2, H2), lambda b, s: (0, 0)),                 # W_f^T
                pl.BlockSpec((1, H2), lambda b, s: (0, 0)),                  # b_f
                pl.BlockSpec((1, H2), lambda b, s: (0, 0)),                  # w_c
                pl.BlockSpec((1, H2), lambda b, s: (0, 0)),                  # v
            ],
            out_specs=(
                pl.BlockSpec((tile_b, tile_s), lambda b, s: (b, s)),         # e (lane-dense)
                pl.BlockSpec((tile_b, H2), lambda b, s: (b, 0)),             # context (resident)
            ),
            scratch_shapes=[
                pltpu.VMEM((tile_b, H2), f32),   # decoder features
                pltpu.VMEM((tile_b, 1), f32),    # running max
                pltpu.VMEM((tile_b, 1), f32),    # running masked denominator
                pltpu.VMEM((tile_b, H2), f32),   # running context accumulator
            ]),
        compiler_params=pltpu.CompilerParams(
            dimension_semantics=("parallel", "arbitrary"),
            vmem_limit_bytes=vmem_limit),
    )(dec, enc_feat, enc_out, mask, cov,
      params["wf_t"], params["bf"], params["wc"], params["v"])

    # ---- kernel 2: normalize scores -> attention, update coverage ---------
    attn_pad, cov_new_pad = pl.pallas_call(
        _finalize_attention_kernel,
        out_shape=(jax.ShapeDtypeStruct((B, s_pad), f32),
                   jax.ShapeDtypeStruct((B, s_pad), f32)),
        grid_spec=pltpu.PrefetchScalarGridSpec(
            num_scalar_prefetch=0,
            grid=(nb,),
            in_specs=[pl.BlockSpec((tile_b, s_pad), lambda b: (b, 0))] * 3,
            out_specs=(pl.BlockSpec((tile_b, s_pad), lambda b: (b, 0)),
                       pl.BlockSpec((tile_b, s_pad), lambda b: (b, 0)))),
        compiler_params=pltpu.CompilerParams(
            dimension_semantics=("parallel",)),
    )(e_scores, mask, cov)

    attention = attn_pad[:, :S]
    new_coverage = None if coverage is None else cov_new_pad[:, :S]
    return context, attention, new_coverage


def attention_reference(params, decoder_hidden, encoder_out, encoder_features,
                        encoder_mask, coverage=None):
    """Pure-JAX transcription of the PyTorch module (for validation)."""
    dec_feat = decoder_hidden @ params["wf_t"] + params["bf"]        # (B, 2H)
    att = encoder_features + dec_feat[None, :, :]                    # (S, B, 2H)
    if coverage is not None:
        att = att + coverage.T[:, :, None] * params["wc"][None, :, :]
    e = jnp.sum(jnp.tanh(att) * params["v"][None, :, :], axis=-1)    # (S, B)
    a = jax.nn.softmax(e, axis=0)
    a = a * encoder_mask
    a = a / jnp.sum(a, axis=0, keepdims=True)
    context = jnp.einsum('sb,bsh->bh', a, encoder_out)               # (B, 2H)
    attention = a.T                                                  # (B, S)
    new_cov = None if coverage is None else coverage + attention
    return context, attention, new_cov


def init_params(hidden_size, key):
    h2 = 2 * hidden_size
    k1, k2, k3, k4 = jax.random.split(key, 4)
    scale = 1.0 / jnp.sqrt(jnp.float32(h2))
    return {
        # Linear(2H, 2H): store W^T so the kernel does x @ W^T
        "wf_t": jax.random.uniform(k1, (h2, h2), jnp.float32, -scale, scale),
        "bf":   jax.random.uniform(k2, (1, h2), jnp.float32, -scale, scale),
        # Linear(1, 2H, bias=False): weight (2H, 1) stored as a (1, 2H) row
        "wc":   jax.random.uniform(k3, (1, h2), jnp.float32, -1.0, 1.0),
        # Linear(2H, 1, bias=False): weight (1, 2H)
        "v":    jax.random.uniform(k4, (1, h2), jnp.float32, -scale, scale),
    }


if __name__ == "__main__":
    hidden = 16          # -> 2H = 32
    B, S, H2 = 2, 8, 2 * hidden

    key = jax.random.PRNGKey(0)
    kp, kd, ke, kf, kc = jax.random.split(key, 5)

    params = init_params(hidden, kp)
    decoder_hidden = jax.random.normal(kd, (B, H2), jnp.float32)
    encoder_out = jax.random.normal(ke, (B, S, H2), jnp.float32)
    encoder_features = jax.random.normal(kf, (S, B, H2), jnp.float32)
    # mask: zero out the last two encoder positions of batch element 1
    encoder_mask = jnp.ones((S, B), jnp.float32).at[S - 2:, 1].set(0.0)
    coverage = jax.random.uniform(kc, (B, S), jnp.float32)

    # Default (bf16-staged) path.
    context, attention, new_coverage = attention_forward(
        params, decoder_hidden, encoder_out, encoder_features, encoder_mask, coverage)
    jax.block_until_ready((context, attention, new_coverage))
    assert context.shape == (B, H2)
    assert attention.shape == (B, S)
    assert new_coverage.shape == (B, S)
    assert bool(jnp.all(jnp.isfinite(context)))
    assert bool(jnp.allclose(jnp.sum(attention, axis=-1), 1.0, atol=1e-3))

    # Exact-storage (f32-staged) path vs pure-JAX reference.
    ctx32, attn32, cov32 = attention_forward(
        params, decoder_hidden, encoder_out, encoder_features, encoder_mask,
        coverage, stage_dtype=jnp.float32)
    with jax.default_matmul_precision("highest"):
        rctx, rattn, rcov = attention_reference(
            params, decoder_hidden, encoder_out, encoder_features, encoder_mask,
            coverage)
    jax.block_until_ready((ctx32, rctx))
    assert bool(jnp.allclose(ctx32, rctx, atol=1e-2, rtol=1e-2))
    assert bool(jnp.allclose(attn32, rattn, atol=1e-2, rtol=1e-2))
    assert bool(jnp.allclose(cov32, rcov, atol=1e-2, rtol=1e-2))

    print("KERNEL_OK")
</pallas_src>

<mosaic_0001>
module attributes {stable_mosaic.version = 11 : i64} {
  func.func @_scores_ctx_kernel(%arg0: i32, %arg1: i32, %arg2: memref<2x32xf32, #tpu.memory_space<vmem>>, %arg3: memref<2x8x32xbf16, #tpu.memory_space<vmem>>, %arg4: memref<2x8x32xbf16, #tpu.memory_space<vmem>>, %arg5: memref<2x8xf32, #tpu.memory_space<vmem>>, %arg6: memref<2x8xf32, #tpu.memory_space<vmem>>, %arg7: memref<32x32xf32, #tpu.memory_space<vmem>>, %arg8: memref<1x32xf32, #tpu.memory_space<vmem>>, %arg9: memref<1x32xf32, #tpu.memory_space<vmem>>, %arg10: memref<1x32xf32, #tpu.memory_space<vmem>>, %arg11: memref<2x8xf32, #tpu.memory_space<vmem>>, %arg12: memref<2x32xf32, #tpu.memory_space<vmem>>, %arg13: memref<2x32xf32, #tpu.memory_space<vmem>>, %arg14: memref<2x1xf32, #tpu.memory_space<vmem>>, %arg15: memref<2x1xf32, #tpu.memory_space<vmem>>, %arg16: memref<2x32xf32, #tpu.memory_space<vmem>>) attributes {dimension_semantics = [#tpu.dimension_semantics<parallel>, #tpu.dimension_semantics<arbitrary>], iteration_bounds = array<i64: 1, 1>, scalar_prefetch = 0 : i64, scratch_operands = 4 : i64, tpu.core_type = #tpu.core_type<tc>, window_params = [{transform_indices = @transform_0, window_bounds = array<i64: 2, 32>}, {transform_indices = @transform_1, window_bounds = array<i64: 2, 8, 32>}, {transform_indices = @transform_2, window_bounds = array<i64: 2, 8, 32>}, {transform_indices = @transform_3, window_bounds = array<i64: 2, 8>}, {transform_indices = @transform_4, window_bounds = array<i64: 2, 8>}, {pipeline_mode = #tpu.pipeline_mode<synchronous>, transform_indices = @transform_5, window_bounds = array<i64: 32, 32>}, {pipeline_mode = #tpu.pipeline_mode<synchronous>, transform_indices = @transform_6, window_bounds = array<i64: 1, 32>}, {pipeline_mode = #tpu.pipeline_mode<synchronous>, transform_indices = @transform_7, window_bounds = array<i64: 1, 32>}, {pipeline_mode = #tpu.pipeline_mode<synchronous>, transform_indices = @transform_8, window_bounds = array<i64: 1, 32>}, {transform_indices = @transform_9, window_bounds = array<i64: 2, 8>}, {transform_indices = @transform_10, window_bounds = array<i64: 2, 32>}]} {
    %c0_i32 = arith.constant 0 : i32
    %0 = arith.cmpi eq, %arg1, %c0_i32 : i32
    %1 = arith.extui %0 : i1 to i32
    %c0_i32_0 = arith.constant 0 : i32
    %2 = arith.cmpi ne, %1, %c0_i32_0 : i32
    scf.if %2 {
      %c0_35 = arith.constant 0 : index
      %c0_36 = arith.constant 0 : index
      %55 = vector.load %arg2[%c0_35, %c0_36] : memref<2x32xf32, #tpu.memory_space<vmem>>, vector<2x32xf32>
      %c0_37 = arith.constant 0 : index
      %c0_38 = arith.constant 0 : index
      %56 = vector.load %arg7[%c0_37, %c0_38] : memref<32x32xf32, #tpu.memory_space<vmem>>, vector<32x32xf32>
      %cst_39 = arith.constant dense<0.000000e+00> : vector<2x32xf32>
      %57 = tpu.matmul %55, %56, %cst_39 {dimension_numbers = #tpu.dot_dimension_numbers<[1], [0], [0], [1], [0, 0, 1, 1], [], []>} : vector<2x32xf32>, vector<32x32xf32>, vector<2x32xf32> -> vector<2x32xf32>
      %c0_40 = arith.constant 0 : index
      %c0_41 = arith.constant 0 : index
      %58 = vector.load %arg8[%c0_40, %c0_41] : memref<1x32xf32, #tpu.memory_space<vmem>>, vector<1x32xf32>
      %59 = vector.broadcast %58 : vector<1x32xf32> to vector<2x32xf32>
      %60 = arith.addf %57, %59 : vector<2x32xf32>
      %c0_42 = arith.constant 0 : index
      %c0_43 = arith.constant 0 : index
      %61 = vector.load %arg13[%c0_42, %c0_43] : memref<2x32xf32, #tpu.memory_space<vmem>>, vector<2x32xf32>
      tpu.vector_store %arg13[%c0_42, %c0_43], %60 {strides = array<i32>} : memref<2x32xf32, #tpu.memory_space<vmem>>, vector<2x32xf32>,
      %cst_44 = arith.constant 0xFF800000 : f32
      %62 = vector.broadcast %cst_44 : f32 to vector<2x1xf32>
      %c0_45 = arith.constant 0 : index
      %c0_46 = arith.constant 0 : index
      %63 = vector.load %arg14[%c0_45, %c0_46] : memref<2x1xf32, #tpu.memory_space<vmem>>, vector<2x1xf32>
      tpu.vector_store %arg14[%c0_45, %c0_46], %62 {strides = array<i32>} : memref<2x1xf32, #tpu.memory_space<vmem>>, vector<2x1xf32>,
      %cst_47 = arith.constant 0.000000e+00 : f32
      %64 = vector.broadcast %cst_47 : f32 to vector<2x1xf32>
      %c0_48 = arith.constant 0 : index
      %c0_49 = arith.constant 0 : index
      %65 = vector.load %arg15[%c0_48, %c0_49] : memref<2x1xf32, #tpu.memory_space<vmem>>, vector<2x1xf32>
      tpu.vector_store %arg15[%c0_48, %c0_49], %64 {strides = array<i32>} : memref<2x1xf32, #tpu.memory_space<vmem>>, vector<2x1xf32>,
      %cst_50 = arith.constant 0.000000e+00 : f32
      %66 = vector.broadcast %cst_50 : f32 to vector<2x32xf32>
      %c0_51 = arith.constant 0 : index
      %c0_52 = arith.constant 0 : index
      %67 = vector.load %arg16[%c0_51, %c0_52] : memref<2x32xf32, #tpu.memory_space<vmem>>, vector<2x32xf32>
      tpu.vector_store %arg16[%c0_51, %c0_52], %66 {strides = array<i32>} : memref<2x32xf32, #tpu.memory_space<vmem>>, vector<2x32xf32>,
    } else {
    }
    %c0 = arith.constant 0 : index
    %c0_1 = arith.constant 0 : index
    %c0_2 = arith.constant 0 : index
    %3 = vector.load %arg3[%c0, %c0_1, %c0_2] : memref<2x8x32xbf16, #tpu.memory_space<vmem>>, vector<2x8x32xbf16>
    %4 = arith.extf %3 : vector<2x8x32xbf16> to vector<2x8x32xf32>
    %c0_3 = arith.constant 0 : index
    %c0_4 = arith.constant 0 : index
    %5 = vector.load %arg13[%c0_3, %c0_4] : memref<2x32xf32, #tpu.memory_space<vmem>>, vector<2x32xf32>
    %6 = vector.shape_cast %5 : vector<2x32xf32> to vector<2x1x32xf32>
    %7 = vector.broadcast %6 : vector<2x1x32xf32> to vector<2x8x32xf32>
    %8 = arith.addf %4, %7 : vector<2x8x32xf32>
    %c0_5 = arith.constant 0 : index
    %c0_6 = arith.constant 0 : index
    %9 = vector.load %arg6[%c0_5, %c0_6] : memref<2x8xf32, #tpu.memory_space<vmem>>, vector<2x8xf32>
    %10 = vector.shape_cast %9 : vector<2x8xf32> to vector<2x8x1xf32>
    %c0_7 = arith.constant 0 : index
    %c0_8 = arith.constant 0 : index
    %11 = vector.load %arg9[%c0_7, %c0_8] : memref<1x32xf32, #tpu.memory_space<vmem>>, vector<1x32xf32>
    %12 = vector.shape_cast %11 : vector<1x32xf32> to vector<1x1x32xf32>
    %13 = vector.broadcast %10 : vector<2x8x1xf32> to vector<2x8x32xf32>
    %14 = vector.broadcast %12 : vector<1x1x32xf32> to vector<2x8x32xf32>
    %15 = arith.mulf %13, %14 : vector<2x8x32xf32>
    %16 = arith.addf %8, %15 : vector<2x8x32xf32>
    %17 = math.tanh %16 : vector<2x8x32xf32>
    %c0_9 = arith.constant 0 : index
    %c0_10 = arith.constant 0 : index
    %18 = vector.load %arg10[%c0_9, %c0_10] : memref<1x32xf32, #tpu.memory_space<vmem>>, vector<1x32xf32>
    %19 = vector.shape_cast %18 : vector<1x32xf32> to vector<1x1x32xf32>
    %20 = vector.broadcast %19 : vector<1x1x32xf32> to vector<2x8x32xf32>
    %21 = arith.mulf %17, %20 : vector<2x8x32xf32>
    %cst = arith.constant dense<0.000000e+00> : vector<2x8xf32>
    %22 = vector.multi_reduction <add>, %21, %cst [2] : vector<2x8x32xf32> to vector<2x8xf32>
    %c0_11 = arith.constant 0 : index
    %c0_12 = arith.constant 0 : index
    %23 = vector.load %arg11[%c0_11, %c0_12] : memref<2x8xf32, #tpu.memory_space<vmem>>, vector<2x8xf32>
    tpu.vector_store %arg11[%c0_11, %c0_12], %22 {strides = array<i32>} : memref<2x8xf32, #tpu.memory_space<vmem>>, vector<2x8xf32>,
    %c0_13 = arith.constant 0 : index
    %c0_14 = arith.constant 0 : index
    %24 = vector.load %arg5[%c0_13, %c0_14] : memref<2x8xf32, #tpu.memory_space<vmem>>, vector<2x8xf32>
    %c0_15 = arith.constant 0 : index
    %c0_16 = arith.constant 0 : index
    %25 = vector.load %arg14[%c0_15, %c0_16] : memref<2x1xf32, #tpu.memory_space<vmem>>, vector<2x1xf32>
    %cst_17 = arith.constant dense<0xFF800000> : vector<2xf32>
    %26 = vector.multi_reduction <maximumf>, %22, %cst_17 [1] : vector<2x8xf32> to vector<2xf32>
    %27 = vector.shape_cast %26 : vector<2xf32> to vector<2x1xf32>
    %28 = arith.maximumf %25, %27 : vector<2x1xf32>
    %29 = arith.subf %25, %28 : vector<2x1xf32>
    %30 = math.exp %29 : vector<2x1xf32>
    %31 = vector.broadcast %28 : vector<2x1xf32> to vector<2x8xf32>
    %32 = arith.subf %22, %31 : vector<2x8xf32>
    %33 = math.exp %32 : vector<2x8xf32>
    %34 = arith.mulf %24, %33 : vector<2x8xf32>
    %c0_18 = arith.constant 0 : index
    %c0_19 = arith.constant 0 : index
    %35 = vector.load %arg15[%c0_18, %c0_19] : memref<2x1xf32, #tpu.memory_space<vmem>>, vector<2x1xf32>
    %36 = arith.mulf %30, %35 : vector<2x1xf32>
    %cst_20 = arith.constant dense<0.000000e+00> : vector<2xf32>
    %37 = vector.multi_reduction <add>, %34, %cst_20 [1] : vector<2x8xf32> to vector<2xf32>
    %38 = vector.shape_cast %37 : vector<2xf32> to vector<2x1xf32>
    %39 = arith.addf %36, %38 : vector<2x1xf32>
    %c0_21 = arith.constant 0 : index
    %c0_22 = arith.constant 0 : index
    %40 = vector.load %arg15[%c0_21, %c0_22] : memref<2x1xf32, #tpu.memory_space<vmem>>, vector<2x1xf32>
    tpu.vector_store %arg15[%c0_21, %c0_22], %39 {strides = array<i32>} : memref<2x1xf32, #tpu.memory_space<vmem>>, vector<2x1xf32>,
    %41 = arith.truncf %34 : vector<2x8xf32> to vector<2x8xbf16>
    %42 = vector.shape_cast %41 : vector<2x8xbf16> to vector<2x1x8xbf16>
    %c0_23 = arith.constant 0 : index
    %c0_24 = arith.constant 0 : index
    %c0_25 = arith.constant 0 : index
    %43 = vector.load %arg4[%c0_23, %c0_24, %c0_25] : memref<2x8x32xbf16, #tpu.memory_space<vmem>>, vector<2x8x32xbf16>
    %cst_26 = arith.constant dense<0.000000e+00> : vector<2x1x32xf32>
    %44 = tpu.matmul %42, %43, %cst_26 {dimension_numbers = #tpu.dot_dimension_numbers<[2], [1], [1], [2], [0, 0, 0, 1, 1, 2], [0], [0]>} : vector<2x1x8xbf16>, vector<2x8x32xbf16>, vector<2x1x32xf32> -> vector<2x1x32xf32>
    %45 = vector.shape_cast %44 : vector<2x1x32xf32> to vector<2x32xf32>
    %c0_27 = arith.constant 0 : index
    %c0_28 = arith.constant 0 : index
    %46 = vector.load %arg16[%c0_27, %c0_28] : memref<2x32xf32, #tpu.memory_space<vmem>>, vector<2x32xf32>
    %47 = vector.broadcast %30 : vector<2x1xf32> to vector<2x32xf32>
    %48 = arith.mulf %47, %46 : vector<2x32xf32>
    %49 = arith.addf %48, %45 : vector<2x32xf32>
    %c0_29 = arith.constant 0 : index
    %c0_30 = arith.constant 0 : index
    %50 = vector.load %arg16[%c0_29, %c0_30] : memref<2x32xf32, #tpu.memory_space<vmem>>, vector<2x32xf32>
    tpu.vector_store %arg16[%c0_29, %c0_30], %49 {strides = array<i32>} : memref<2x32xf32, #tpu.memory_space<vmem>>, vector<2x32xf32>,
    %c0_31 = arith.constant 0 : index
    %c0_32 = arith.constant 0 : index
    %51 = vector.load %arg14[%c0_31, %c0_32] : memref<2x1xf32, #tpu.memory_space<vmem>>, vector<2x1xf32>
    tpu.vector_store %arg14[%c0_31, %c0_32], %28 {strides = array<i32>} : memref<2x1xf32, #tpu.memory_space<vmem>>, vector<2x1xf32>,
    %c0_i32_33 = arith.constant 0 : i32
    %52 = arith.cmpi eq, %arg1, %c0_i32_33 : i32
    %53 = arith.extui %52 : i1 to i32
    %c0_i32_34 = arith.constant 0 : i32
    %54 = arith.cmpi ne, %53, %c0_i32_34 : i32
    scf.if %54 {
      %c0_35 = arith.constant 0 : index
      %c0_36 = arith.constant 0 : index
      %55 = vector.load %arg16[%c0_35, %c0_36] : memref<2x32xf32, #tpu.memory_space<vmem>>, vector<2x32xf32>
      %c0_37 = arith.constant 0 : index
      %c0_38 = arith.constant 0 : index
      %56 = vector.load %arg15[%c0_37, %c0_38] : memref<2x1xf32, #tpu.memory_space<vmem>>, vector<2x1xf32>
      %57 = tpu.reciprocal %56 : vector<2x1xf32> -> vector<2x1xf32>
      %58 = vector.broadcast %57 : vector<2x1xf32> to vector<2x32xf32>
      %59 = arith.mulf %55, %58 : vector<2x32xf32>
      %c0_39 = arith.constant 0 : index
      %c0_40 = arith.constant 0 : index
      %60 = vector.load %arg12[%c0_39, %c0_40] : memref<2x32xf32, #tpu.memory_space<vmem>>, vector<2x32xf32>
      tpu.vector_store %arg12[%c0_39, %c0_40], %59 {strides = array<i32>} : memref<2x32xf32, #tpu.memory_space<vmem>>, vector<2x32xf32>,
    } else {
    }
    return
  }
  func.func @transform_0(%arg0: i32, %arg1: i32) -> (i32, i32) {
    %c0_i32 = arith.constant 0 : i32
    %c0_i32_0 = arith.constant 0 : i32
    return %arg0, %c0_i32 : i32, i32
  }
  func.func @transform_1(%arg0: i32, %arg1: i32) -> (i32, i32, i32) {
    %c0_i32 = arith.constant 0 : i32
    %c0_i32_0 = arith.constant 0 : i32
    return %arg0, %arg1, %c0_i32 : i32, i32, i32
  }
  func.func @transform_2(%arg0: i32, %arg1: i32) -> (i32, i32, i32) {
    %c0_i32 = arith.constant 0 : i32
    %c0_i32_0 = arith.constant 0 : i32
    return %arg0, %arg1, %c0_i32 : i32, i32, i32
  }
  func.func @transform_3(%arg0: i32, %arg1: i32) -> (i32, i32) {
    %c0_i32 = arith.constant 0 : i32
    return %arg0, %arg1 : i32, i32
  }
  func.func @transform_4(%arg0: i32, %arg1: i32) -> (i32, i32) {
    %c0_i32 = arith.constant 0 : i32
    return %arg0, %arg1 : i32, i32
  }
  func.func @transform_5(%arg0: i32, %arg1: i32) -> (i32, i32) {
    %c0_i32 = arith.constant 0 : i32
    %c0_i32_0 = arith.constant 0 : i32
    %c0_i32_1 = arith.constant 0 : i32
    return %c0_i32, %c0_i32_0 : i32, i32
  }
  func.func @transform_6(%arg0: i32, %arg1: i32) -> (i32, i32) {
    %c0_i32 = arith.constant 0 : i32
    %c0_i32_0 = arith.constant 0 : i32
    %c0_i32_1 = arith.constant 0 : i32
    return %c0_i32, %c0_i32_0 : i32, i32
  }
  func.func @transform_7(%arg0: i32, %arg1: i32) -> (i32, i32) {
    %c0_i32 = arith.constant 0 : i32
    %c0_i32_0 = arith.constant 0 : i32
    %c0_i32_1 = arith.constant 0 : i32
    return %c0_i32, %c0_i32_0 : i32, i32
  }
  func.func @transform_8(%arg0: i32, %arg1: i32) -> (i32, i32) {
    %c0_i32 = arith.constant 0 : i32
    %c0_i32_0 = arith.constant 0 : i32
    %c0_i32_1 = arith.constant 0 : i32
    return %c0_i32, %c0_i32_0 : i32, i32
  }
  func.func @transform_9(%arg0: i32, %arg1: i32) -> (i32, i32) {
    %c0_i32 = arith.constant 0 : i32
    return %arg0, %arg1 : i32, i32
  }
  func.func @transform_10(%arg0: i32, %arg1: i32) -> (i32, i32) {
    %c0_i32 = arith.constant 0 : i32
    %c0_i32_0 = arith.constant 0 : i32
    return %arg0, %c0_i32 : i32, i32
  }
}

</mosaic_0001>

<bundles_post_ra>
// kernel: tpu_custom_call.1
= control target key start
LH: loop header
LB: loop body
LE: loop exit
PB: predicated region body
PF: predicated region fallthrough
CT: control target
= control target key end

     0   :  { %16 = vsyncpa [#allocation7], 0  ;;  %s731_s0 = inlined_call_operand.hbm [shape: f32[2,32], index: 0, kind: input, shape index: {}]   ;;  %s732_s1 = inlined_call_operand.hbm [shape: bf16[2,8,32], index: 1, kind: input, shape index: {}]   ;;  %s733_s2 = inlined_call_operand.hbm [shape: bf16[2,8,32], index: 2, kind: input, shape index: {}]   ;;  %s734_s3 = inlined_call_operand.vmem [shape: f32[2,8], index: 3, kind: input, shape index: {}]   ;;  %s735_s4 = inlined_call_operand.hbm [shape: f32[2,8], index: 4, kind: input, shape index: {}]   ;;  %s736_s5 = inlined_call_operand.hbm [shape: f32[32,32], index: 5, kind: input, shape index: {}]   ;;  %s737_s6 = inlined_call_operand.vmem [shape: f32[1,32], index: 6, kind: input, shape index: {}]   ;;  %s738_s7 = inlined_call_operand.vmem [shape: f32[1,32], index: 7, kind: input, shape index: {}]   ;;  %s739_s8 = inlined_call_operand.vmem [shape: f32[1,32], index: 8, kind: input, shape index: {}]   ;;  %s740_s9 = inlined_call_operand.hbm [shape: f32[2,8], index: 9, kind: output, shape index: {0}]   ;;  %s741_s10 = inlined_call_operand.hbm [shape: f32[2,32], index: 10, kind: output, shape index: {1}]  }
   0x1   :  { %17 = vsyncpa [#allocation10], 0 }
   0x2   :  { %18 = vsyncpa [#allocation13], 0 }
   0x3   :  { %19 = vsyncpa [#allocation8], 0  ;;  %s36_s15 = sshll.u32 %s732_s1, 4  ;;  %s37_s15 = int_to_ptr.hbm [resolvable:$true] %s36_s15 }
   0x4   :  { %20 = vsyncpa [#allocation17], 0  ;;  %s612_s16 = smov [#allocation9]   ;;  %s65_s20 = sshll.u32 %s735_s4, 4  ;;  %s66_s20 = int_to_ptr.hbm [resolvable:$true] %s65_s20 }
   0x5   :  { %s38_s17 = sshll.u32 %s612_s16, 4  ;;  %s613_s21 = smov 64   ;;  %s39_s17 = int_to_ptr.vmem [resolvable:$true] %s38_s17 }
   0x6   :  { %s614_s22 = smov 4   ;;  %s615_s23 = smov [#allocation12]  }
   0x7   :  { %44 = dma.hbm_to_vmem [thread:$0]  %s37_s15, 128, %s39_s17, [#allocation10], %s613_s21, %s613_s21, %s614_s22  }
   0x8   :  { %s67_s24 = sshll.u32 %s615_s23, 4  ;;  %s26_s27 = sshll.u32 %s731_s0, 4  ;;  %s68_s24 = int_to_ptr.vmem [resolvable:$true] %s67_s24  ;;  %s27_s27 = int_to_ptr.hbm [resolvable:$true] %s26_s27 }
   0x9   :  { %70 = dma.hbm_to_vmem [thread:$0]  %s66_s20, 32, %s68_s24, [#allocation13]  }
   0xa   :  { %s49_s29 = sshll.u32 %s733_s2, 4  ;;  %s616_s30 = smov [#allocation6]   ;;  %s50_s29 = int_to_ptr.hbm [resolvable:$true] %s49_s29 }
   0xb   :  { %s28_s11 = sshll.u32 %s616_s30, 4  ;;  %s617_s4 = smov [#allocation11]   ;;  %s29_s11 = int_to_ptr.vmem [resolvable:$true] %s28_s11 }
   0xc   :  { %31 = dma.hbm_to_vmem [thread:$0]  %s27_s27, 32, %s29_s11, [#allocation7]  }
   0xd   :  { %s51_s12 = sshll.u32 %s617_s4, 4  ;;  %s75_s15 = sshll.u32 %s736_s5, 4  ;;  %s52_s12 = int_to_ptr.vmem [resolvable:$true] %s51_s12  ;;  %s76_s15 = int_to_ptr.hbm [resolvable:$true] %s75_s15 }
   0xe   :  { %57 = dma.hbm_to_vmem [thread:$0]  %s50_s29, 128, %s52_s12, [#allocation10], %s613_s21, %s613_s21, %s614_s22  }
   0xf   :  { %s618_s0 = smov [#allocation14]   ;;  %s619_s17 = smov 128  }
  0x10   :  { %s77_s16 = sshll.u32 %s618_s0, 4  ;;  %s620_s18 = smov 8   ;;  %s78_s16 = int_to_ptr.vmem [resolvable:$true] %s77_s16 }
  0x11   :  { %83 = dma.hbm_to_vmem [thread:$0]  %s76_s15, 512, %s78_s16, [#allocation13], %s619_s17, %s619_s17, %s620_s18  }
  0x12   :  { %602 = dma.done.wait [#allocation7], 32  }
  0x13   :  { %603 = vsyncadd [#allocation7], 4294967264 }
  0x14   :  { %604 = dma.done.wait [#allocation10], 256  }
  0x15   :  { %605 = vsyncadd [#allocation10], 4294967040 }
  0x16   :  { %606 = dma.done.wait [#allocation13], 544  }
  0x17   :  { %607 = vsyncadd [#allocation13], 4294966752  ;;  %v169_v0 = vlaneseq  ;;  %v119_v2 = vld [vmem:[#allocation14 + $0x18] sm:$0xff]  ;;  %v118_v3 = vld [vmem:[#allocation14 + $0x10] sm:$0xff]  ;;  %vm124_vm0 = vcmask 261120   ;;  %vm148_vm1 = vcmask 254976  }
  0x18   :  { %140 = vmatpush.msra.mxu0 %v119_v2  ;;  %v167_v4 = vld [vmem:[#allocation12] sm:$0x3]  ;;  %v117_v5 = vld [vmem:[#allocation14 + $0x8] sm:$0xff]  ;;  %v116_v7 = vld [vmem:[#allocation14] sm:$0xff]  ;;  %v621_v10 = vmov 0.0   ;;  %vm150_vm2 = vcmask 1024  }
  0x19   :  { %v170_v1 = vshrl.u32 %v169_v0, 7  ;;  %v168_v6 = vperm.slane %v167_v4, 0  ;;  %v115_v8 = vld [vmem:[#allocation6] sm:$0x3]  ;;  %v175_v9 = vperm.slane %v167_v4, 1  ;;  %v398_v15 = vld [vmem:[#allocation9] sm:$0xff]  }
  0x1a   :  { %141 = vmatpush.msra.mxu0 %v118_v3  ;;  %153 = vst.msk [vmem:[#allocation5] sm:$0x3] %vm148_vm1, %v621_v10  ;;  %v419_v11 = vld [vmem:[%s737_s6] ss:$0 sm:$0xff]  ;;  %v399_v17 = vunpack.c.l.bf16 %v398_v15  ;;  %v400_v21 = vunpack.c.h.bf16 %v398_v15  ;;  %v622_v37 = vmov -inf   ;;  %v208_v39 = vand.u32 127, %v169_v0 }
  0x1b   :  { %415 = vset.pattern.permute.xlu0 %v170_v1  ;;  %v420_v16 = vld [vmem:[%s738_s7] ss:$0 sm:$0xff]  ;;  %151 = vst.msk [vmem:[#allocation3] sm:$0x3] %vm150_vm2, %v622_v37  ;;  %vm211_vm3 = vcmask 1041409   ;;  %vm214_vm4 = vcmask 58368  }
  0x1c   :  { %142 = vmatpush.msra.mxu0 %v117_v5  ;;  %v421_v30 = vld [vmem:[%s739_s8] ss:$0 sm:$0xff]  ;;  %152 = vst.msk [vmem:[#allocation4] sm:$0x3] %vm150_vm2, %v621_v10  ;;  %v623_v45 = vmov 0   ;;  %vm278_vm5 = vcmask 1043456  }
  0x1d   :  { %416 = vset.pattern.permute.xlu2 %v623_v45  ;;  %418 = vset.pattern.permute.xlu1 %v623_v45  ;;  %v270_v61 = vld [vmem:[#allocation11] sm:$0xf]  ;;  %v271_v62 = vld [vmem:[#allocation11 + $0x4] sm:$0xf]  ;;  %v216_v5 = vld [vmem:[%s734_s3] sm:$0x3] }
  0x1e   :  { %143 = vmatpush.msra.mxu0 %v116_v7  ;;  %v280_v63 = vsel %vm278_vm5, %v270_v61, 0  ;;  %v301_v0 = vsel %vm278_vm5, %v271_v62, 0  ;;  %vm263_vm6 = vcmask 1040384   ;;  %vm274_vm7 = vcmask 64512   ;;  %s624_s22 = smov [#allocation15]   ;;  %s365_s25 = sshll.u32 %s740_s9, 4  ;;  %s366_s25 = int_to_ptr.hbm [resolvable:$true] %s365_s25 }
  0x1f   :  { %393 = vmatmul.msk.f32.vlgmr.msra.gmra.mxu0 %vm124_vm0, %v115_v8  ;;  %289 = vmatpush.bf16.msra.mxu1 %v280_v63  ;;  %s363_s3 = sshll.u32 %s624_s22, 4  ;;  %s625_s9 = smov [#allocation16]   ;;  %s364_s3 = int_to_ptr.vmem [resolvable:$true] %s363_s3 }
  0x20   :  { %310 = vmatpush.bf16.msra.mxu2 %v301_v0  ;;  %s374_s26 = sshll.u32 %s625_s9, 4  ;;  %s376_s28 = sshll.u32 %s741_s10, 4  ;;  %s375_s26 = int_to_ptr.vmem [resolvable:$true] %s374_s26  ;;  %s377_s28 = int_to_ptr.hbm [resolvable:$true] %s376_s28 }
  0x22   :  { %v217_v46 = vld [vmem:[#allocation3] sm:$0x3] }
  0x23   :  { %173 = vperm.xlu0 %415, %v168_v6  }
  0x2b   :  { %180 = vperm.xlu0 %415, %v175_v9  }
  0x33   :  { %417 = vset.pattern.permute.xlu0 %v623_v45 }
  0x95   :  { %v174_v14 = vpop.permute.xlu0 %173 }
  0x96   :  { %v186_v20 = vmul.f32 %v420_v16, %v174_v14 }
  0x9c   :  { %v145_v12 = vpop.f32.mrf.mxu0 }
  0x9d   :  { %v146_v13 = vadd.f32 %v419_v11, %v145_v12  ;;  %v181_v23 = vpop.permute.xlu0 %180 }
  0x9e   :  { %v187_v28 = vmul.f32 %v420_v16, %v181_v23 }
  0x9f   :  { %149 = vst.msk [vmem:[#allocation2] sm:$0x3] %vm148_vm1, %v146_v13 }
  0xa6   :  { %v158_v18 = vld [vmem:[#allocation2] sm:$0x3] }
  0xa7   :  { %v161_v19 = vperm.slane %v158_v18, 0  ;;  %v160_v22 = vrot.slane %v158_v18, 1 }
  0xa9   :  { %v165_v24 = vadd.f32 %v399_v17, %v161_v19  ;;  %v162_v25 = vperm.slane %v160_v22, 0  ;;  %v252_v17 = vld [vmem:[#allocation4] sm:$0x3] }
  0xab   :  { %v188_v26 = vadd.f32 %v186_v20, %v165_v24  ;;  %v166_v27 = vadd.f32 %v400_v21, %v162_v25 }
  0xad   :  { %422 = vtanh.f32 %v188_v26  ;;  %v189_v29 = vadd.f32 %v187_v28, %v166_v27 }
  0xaf   :  { %424 = vtanh.f32 %v189_v29 }
  0xb3   :  { %v423_v31 = vpop.eup %422 }
  0xb4   :  { %v196_v32 = vmul.f32 %v423_v31, %v421_v30 }
  0xb5   :  { %v425_v34 = vpop.eup %424 }
  0xb6   :  { %v199_v33 = vsel %vm124_vm0, %v196_v32, 0.0  ;;  %v197_v35 = vmul.f32 %v425_v34, %v421_v30  ;;  %v316_v30 = vld [vmem:[#allocation5] sm:$0x3] }
  0xb7   :  { %200 = vadd.xlane.f32.xlu1 %v199_v33 }
  0xb8   :  { %v202_v36 = vsel %vm124_vm0, %v197_v35, 0.0 }
  0xbf   :  { %203 = vadd.xlane.f32.xlu1 %v202_v36 }
 0x12a   :  { %v201_v38 = vpop.xlane.xlu1 %200 }
 0x12b   :  { %v209_v41 = vperm.slane %v201_v38, %v208_v39 }
 0x132   :  { %v204_v40 = vpop.xlane.xlu1 %203 }
 0x133   :  { %v210_v42 = vperm.slane %v204_v40, %v208_v39 }
 0x135   :  { %v212_v43 = vsel %vm211_vm3, %v210_v42, %v209_v41 }
 0x136   :  { %v218_v44 = vsel %vm214_vm4, %v212_v43, -inf  ;;  %215 = vst.msk [vmem:[#allocation15] sm:$0x3] %vm214_vm4, %v212_v43 }
 0x137   :  { %219 = vmax.xlane.f32.xlu2 %v218_v44  ;;  %368 = dma.vmem_to_hbm [thread:$0]  %s364_s3, 32, %s366_s25, [#allocation8]  }
 0x1aa   :  { %v220_v47 = vpop.xlane.xlu2 %219 }
 0x1ab   :  { %v221_v48 = vmax.f32 %v217_v46, %v220_v47 }
 0x1ad   :  { %v222_v49 = vsub.f32 %v217_v46, %v221_v48  ;;  %331 = vst.msk [vmem:[#allocation3] sm:$0x3] %vm150_vm2, %v221_v48  ;;  %227 = vperm.xlu2 %416, %v221_v48  }
 0x1af   :  { %v223_v50 = vmul.f32 1.442695, %v222_v49 }
 0x1b1   :  { %426 = vpow2.f32 %v223_v50 }
 0x1b7   :  { %v427_v51 = vpop.eup %426 }
 0x1b8   :  { %319 = vperm.xlu2 %416, %v427_v51   ;;  %v253_v18 = vmul.f32 %v427_v51, %v252_v17 }
 0x207   :  { %v228_v52 = vpop.permute.xlu2 %227 }
 0x208   :  { %v229_v53 = vperm.slane %v228_v52, 0  ;;  %v230_v54 = vperm.slane %v228_v52, 1 }
 0x20a   :  { %v233_v55 = vsub.f32 %v201_v38, %v229_v53  ;;  %v234_v56 = vsub.f32 %v204_v40, %v230_v54 }
 0x20c   :  { %v235_v57 = vmul.f32 1.442695, %v233_v55  ;;  %v237_v58 = vmul.f32 1.442695, %v234_v56 }
 0x20e   :  { %428 = vpow2.f32 %v235_v57 }
 0x20f   :  { %430 = vpow2.f32 %v237_v58 }
 0x212   :  { %v320_v31 = vpop.permute.xlu2 %319 }
 0x213   :  { %v322_v38 = vmul.f32 %v320_v31, %v316_v30 }
 0x214   :  { %v429_v59 = vpop.eup %428 }
 0x215   :  { %v431_v60 = vpop.eup %430  ;;  %242 = vperm.xlu0 %417, %v429_v59  }
 0x216   :  { %245 = vperm.xlu1 %418, %v431_v60  }
 0x287   :  { %v243_v1 = vpop.permute.xlu0 %242 }
 0x288   :  { %v246_v2 = vpop.permute.xlu1 %245  ;;  %v247_v3 = vperm.slane %v243_v1, %v208_v39 }
 0x289   :  { %v248_v4 = vperm.slane %v246_v2, %v208_v39 }
 0x28b   :  { %v249_v6 = vsel %vm211_vm3, %v248_v4, %v247_v3 }
 0x28c   :  { %v251_v7 = vmul.f32 %v249_v6, %v216_v5 }
 0x28e   :  { %v254_v8 = vsel %vm214_vm4, %v251_v7, 0.0  ;;  %v260_v9 = vpack.c.bf16 %v251_v7, %v251_v7 }
 0x28f   :  { %255 = vadd.xlane.f32.xlu0 %v254_v8 }
 0x290   :  { %v262_v10 = vrot.slane %v260_v9, 3 }
 0x292   :  { %v266_v11 = vsel %vm263_vm6, %v260_v9, %v262_v10 }
 0x293   :  { %v394_v12 = vpack.i.b16 %v266_v11, %v266_v11  ;;  %v269_v13 = vunpack.i.h.s16 %v266_v11 }
 0x295   :  { %v273_v14 = vperm.slane %v394_v12, 0  ;;  %v295_v15 = vpack.i.b16 %v269_v13, %v269_v13 }
 0x297   :  { %395 = vmatmul.msk.bf16.vlgmr.msra.gmra.mxu1 %vm274_vm7, %v273_v14  ;;  %v296_v16 = vperm.slane %v295_v15, 0 }
 0x299   :  { %396 = vmatmul.msk.bf16.vlgmr.msra.gmra.mxu2 %vm274_vm7, %v296_v16 }
 0x302   :  { %v256_v19 = vpop.xlane.xlu0 %255 }
 0x303   :  { %v257_v20 = vadd.f32 %v256_v19, %v253_v18 }
 0x305   :  { %259 = vst.msk [vmem:[#allocation4] sm:$0x3] %vm150_vm2, %v257_v20 }
 0x30c   :  { %v336_v21 = vld [vmem:[#allocation4] sm:$0x3] }
 0x30d   :  { %432 = vrcp.f32 %v336_v21  ;;  %v348_v26 = vand.u32 2147483648, %v336_v21  ;;  %v346_v28 = vand.u32 2147483647, %v336_v21  ;;  %vm342_vm9 = vweird.f32 %v336_v21 }
 0x30f   :  { %v349_v32 = vor.u32 1.1754944e-38, %v348_v26  ;;  %vm347_vm11 = vcmp.eq.f32.partialorder %v346_v28, 8.507059e+37 }
 0x313   :  { %v433_v22 = vpop.eup %432 }
 0x314   :  { %v291_v23 = vpop.f32.mrf.mxu1  ;;  %v338_v24 = vmul.f32 %v433_v22, %v336_v21  ;;  %vm343_vm8 = vweird.f32 %v433_v22 }
 0x315   :  { %vm344_vm10 = vmor %vm342_vm9, %vm343_vm8 }
 0x316   :  { %v339_v25 = vsub.f32 1.0, %v338_v24 }
 0x318   :  { %v340_v27 = vmul.f32 %v433_v22, %v339_v25 }
 0x31a   :  { %v341_v29 = vadd.f32 %v433_v22, %v340_v27 }
 0x31c   :  { %v293_v33 = vpop.f32.mrf.mxu1  ;;  %v312_v34 = vpop.f32.mrf.mxu2  ;;  %v345_v35 = vsel %vm344_vm10, %v433_v22, %v341_v29 }
 0x31d   :  { %v325_v36 = vrot.slane %v312_v34, 7  ;;  %v350_v37 = vsel %vm347_vm11, %v349_v32, %v345_v35 }
 0x31e   :  { %353 = vperm.xlu2 %416, %v350_v37  }
 0x31f   :  { %v326_v39 = vsel %vm211_vm3, %v325_v36, %v291_v23 }
 0x320   :  { %v328_v40 = vadd.f32 %v326_v39, %v322_v38 }
 0x322   :  { %330 = vst.msk [vmem:[#allocation5] sm:$0x3] %vm148_vm1, %v328_v40 }
 0x324   :  { %v314_v41 = vpop.f32.mrf.mxu2 }
 0x329   :  { %v335_v42 = vld [vmem:[#allocation5] sm:$0x3] }
 0x378   :  { %v354_v43 = vpop.permute.xlu2 %353 }
 0x379   :  { %v356_v44 = vmul.f32 %v354_v43, %v335_v42 }
 0x37b   :  { %357 = vst.msk [vmem:[#allocation16] sm:$0x3] %vm148_vm1, %v356_v44 }
 0x37c   :  { %379 = dma.vmem_to_hbm [thread:$0]  %s375_s26, 32, %s377_s28, [#allocation17]  }
 0x37d   :  { %608 = dma.done.wait [#allocation8], 32  }
 0x37e   :  { %609 = vsyncadd [#allocation8], 4294967264 }
 0x37f   :  { %610 = dma.done.wait [#allocation17], 32  }
 0x380   :  { %611 = vsyncadd [#allocation17], 4294967264 }
 0x381   :  { %388 = vsyncpa [#allocation7], 1 }
 0x382   :  { %389 = vsyncpa [#allocation10], 1 }
 0x383   :  { %390 = vsyncpa [#allocation13], 1 }
 0x384   :  { %391 = vsyncpa [#allocation8], 1 }
 0x385   :  { %392 = vsyncpa [#allocation17], 1 }

</bundles_post_ra>
